<compile_context>
chip_gen: v7x
topology: tpu7x:2x2x1
jax: 0.10.0
libtpu: 0.0.40
codegen_flags: <defaults>
</compile_context>

<pallas_src>
import functools

import jax
import jax.numpy as jnp
from jax.experimental import pallas as pl
from jax.experimental.pallas import tpu as pltpu


# ----------------------------- Pallas kernel --------------------------------

def period_kernel(x_ref, w_ref, b_ref, out_ref):
    # x_ref : (TR, L)        bf16 activation rows (batch*enc_in tile)
    # w_ref : (L, Npad)      bf16 fully-folded weight (conv+res ∘ lin1 ∘ lin2)
    # b_ref : (1, Npad)      f32 folded bias
    # out   : (TR, Npad)     f32
    out_ref[...] = (
        jnp.dot(x_ref[...], w_ref[...], preferred_element_type=jnp.float32)
        + b_ref[...]
    )


# ------------------------------ tiling helper --------------------------------

def _row_tiling(rows, max_tile=512, row_align=16, min_steps=1):
    """Pick (padded_rows, tile). Tile is a multiple of `row_align` (16 for
    bf16 sublane packing), capped at `max_tile`. No forced extra grid steps
    for small row counts (per-step overhead ~0.35us); on v7x one may pass
    min_steps=2 to shard the 'parallel' row axis across both TensorCores."""
    r_aligned = -(-rows // row_align) * row_align
    steps = max(min_steps, -(-r_aligned // max_tile))
    tile = row_align * (-(-r_aligned // (row_align * steps)))
    return steps * tile, tile


# ------------------------------ JAX wrapper ----------------------------------

@functools.partial(jax.jit, static_argnames=("enc_in", "pred_len"))
def period_forward(x, W, bias, *, enc_in, pred_len):
    """x: (B, seq_len, enc_in). W: (seq_len, Npad) bf16. bias: (1, Npad) f32.
    Returns (B, enc_in, pred_len) f32."""
    B, seq_len, C = x.shape
    R = B * enc_in
    n_pad = W.shape[1]

    # glue: (B, L, C) -> (B, C, L) -> (R, L), cast fused into the same copy.
    xr = jnp.transpose(x, (0, 2, 1)).reshape(R, seq_len).astype(jnp.bfloat16)

    R_pad, TR = _row_tiling(R)
    if R_pad != R:
        xr = jnp.pad(xr, ((0, R_pad - R), (0, 0)))

    flops = 2 * R_pad * seq_len * n_pad
    bytes_accessed = (R_pad * seq_len * 2          # x (bf16)
                      + seq_len * n_pad * 2        # W (bf16, resident)
                      + n_pad * 4                  # bias (f32)
                      + R_pad * n_pad * 4)         # out (f32)

    out = pl.pallas_call(
        period_kernel,
        out_shape=jax.ShapeDtypeStruct((R_pad, n_pad), jnp.float32),
        grid=(R_pad // TR,),
        in_specs=[
            pl.BlockSpec((TR, seq_len), lambda i: (i, 0)),     # activations
            pl.BlockSpec((seq_len, n_pad), lambda i: (0, 0)),  # W (resident)
            pl.BlockSpec((1, n_pad), lambda i: (0, 0)),        # bias (resident)
        ],
        out_specs=pl.BlockSpec((TR, n_pad), lambda i: (i, 0)),
        compiler_params=pltpu.CompilerParams(
            dimension_semantics=("parallel",)
        ),
        cost_estimate=pl.CostEstimate(
            flops=flops, transcendentals=0, bytes_accessed=bytes_accessed),
    )(xr, W, bias)

    return out[:R, :pred_len].reshape(B, enc_in, pred_len)


# --------------------- parameter init + one-time folding ---------------------

def make_params(key, seq_len, pred_len, period_len):
    """Raw parameters, matching the PyTorch module's layers."""
    P = period_len
    seg_x = seq_len // P
    seg_y = pred_len // P
    pad = P // 2
    K = 1 + 2 * pad

    def uniform(k, shape, fan_in):
        bound = 1.0 / jnp.sqrt(jnp.float32(fan_in))
        return jax.random.uniform(k, shape, jnp.float32, -bound, bound)

    k_c, k_w1, k_b1, k_w2, k_b2 = jax.random.split(key, 5)
    w_conv = uniform(k_c, (K,), K)                 # conv1d weight (1,1,K) -> (K,)
    W1 = uniform(k_w1, (seg_y, seg_x), seg_x)      # linear1.weight (out, in)
    b1 = uniform(k_b1, (seg_y,), seg_x)
    W2 = uniform(k_w2, (P, P), P)                  # linear2.weight
    b2 = uniform(k_b2, (P,), P)
    return w_conv, W1, b1, W2, b2


def fold_params(params, seq_len, pred_len, period_len):
    """Fold conv+residual (banded matrix A) and the two linears (+biases,
    Kronecker matrix M) into a single GEMM weight W = A @ M and a bias row.
    Output columns are zero-padded to a multiple of 128 for lane-dense
    stores; W is cast to bf16, bias kept in f32. Done once at init
    (parameter-sized work only)."""
    w_conv, W1, b1, W2, b2 = params
    P = period_len
    pad = P // 2
    K = 1 + 2 * pad

    # conv (cross-correlation, zero 'same' padding) + residual as banded matrix
    s_idx = jnp.arange(seq_len)[:, None]
    t_idx = jnp.arange(seq_len)[None, :]
    k_idx = s_idx - t_idx + pad
    band = jnp.where((k_idx >= 0) & (k_idx < K),
                     w_conv[jnp.clip(k_idx, 0, K - 1)], 0.0)
    A = band + jnp.eye(seq_len, dtype=jnp.float32)

    # linear1 (segments) then linear2 (periods) as one Kronecker matrix:
    # M[i*P+p, j*P+q] = W1[j, i] * W2[q, p]
    M = jnp.einsum("ji,qp->ipjq", W1, W2).reshape(seq_len, pred_len)

    # bias[j*P+q] = b1[j] * sum_p W2[q, p] + b2[q]
    w2sum = jnp.sum(W2, axis=1)
    bias = (b1[:, None] * w2sum[None, :] + b2[None, :]).reshape(1, pred_len)

    # Full fold: (x @ A) @ M == x @ (A @ M)
    W = (A @ M).astype(jnp.float32)                # (seq_len, pred_len)

    n_pad = -(-pred_len // 128) * 128              # lane-dense output columns
    if n_pad != pred_len:
        W = jnp.pad(W, ((0, 0), (0, n_pad - pred_len)))
        bias = jnp.pad(bias, ((0, 0), (0, n_pad - pred_len)))

    return W.astype(jnp.bfloat16), bias.astype(jnp.float32)


# ------------------------------ pure-JAX reference ---------------------------

def period_reference(x, params, seq_len, pred_len, enc_in, period_len):
    """Literal f32 translation of the PyTorch forward."""
    w_conv, W1, b1, W2, b2 = params
    B = x.shape[0]
    P = period_len
    seg_x = seq_len // P
    pad = P // 2
    K = 1 + 2 * pad

    xt = jnp.transpose(x, (0, 2, 1)).reshape(-1, seq_len)     # (R, L)
    xp = jnp.pad(xt, ((0, 0), (pad, pad)))
    conv = jnp.zeros_like(xt)
    for k in range(K):
        conv = conv + w_conv[k] * xp[:, k:k + seq_len]
    s = conv + xt

    S = s.reshape(-1, seg_x, P)
    Xt = jnp.transpose(S, (0, 2, 1))                          # (R, P, seg_x)
    Y1 = jnp.einsum("rpi,ji->rpj", Xt, W1) + b1               # (R, P, seg_y)
    Y1t = jnp.transpose(Y1, (0, 2, 1))                        # (R, seg_y, P)
    Y2 = jnp.einsum("rjp,qp->rjq", Y1t, W2) + b2              # (R, seg_y, P)
    return Y2.reshape(B, enc_in, pred_len)


# ----------------------------------- main ------------------------------------

if __name__ == "__main__":
    SEQ_IN_LEN, SEQ_OUT_LEN = 64, 32
    ENC_IN, PERIOD_LEN = 16, 8
    BATCH = 4

    key = jax.random.PRNGKey(0)
    k_x, k_par = jax.random.split(key)

    x = jax.random.normal(k_x, (BATCH, SEQ_IN_LEN, ENC_IN), jnp.float32)

    params = make_params(k_par, SEQ_IN_LEN, SEQ_OUT_LEN, PERIOD_LEN)
    W, bias = fold_params(params, SEQ_IN_LEN, SEQ_OUT_LEN, PERIOD_LEN)

    out = period_forward(x, W, bias, enc_in=ENC_IN, pred_len=SEQ_OUT_LEN)
    out = jax.block_until_ready(out)

    ref = period_reference(x, params, SEQ_IN_LEN, SEQ_OUT_LEN, ENC_IN,
                           PERIOD_LEN)

    assert out.shape == (BATCH, ENC_IN, SEQ_OUT_LEN)
    max_err = float(jnp.max(jnp.abs(out - ref)))
    # bf16 activations/weights with f32 accumulation -> looser tolerance.
    assert jnp.allclose(out, ref, atol=2e-2, rtol=2e-2), (
        f"mismatch vs reference (max abs err {max_err})")

    print("KERNEL_OK")
</pallas_src>

<mosaic_0001>
module attributes {stable_mosaic.version = 11 : i64} {
  func.func @period_kernel(%arg0: i32, %arg1: memref<64x64xbf16, #tpu.memory_space<vmem>>, %arg2: memref<64x128xbf16, #tpu.memory_space<vmem>>, %arg3: memref<1x128xf32, #tpu.memory_space<vmem>>, %arg4: memref<64x128xf32, #tpu.memory_space<vmem>>) attributes {dimension_semantics = [#tpu.dimension_semantics<parallel>], iteration_bounds = array<i64: 1>, scalar_prefetch = 0 : i64, scratch_operands = 0 : i64, tpu.core_type = #tpu.core_type<tc>, window_params = [{transform_indices = @transform_0, window_bounds = array<i64: 64, 64>}, {pipeline_mode = #tpu.pipeline_mode<synchronous>, transform_indices = @transform_1, window_bounds = array<i64: 64, 128>}, {pipeline_mode = #tpu.pipeline_mode<synchronous>, transform_indices = @transform_2, window_bounds = array<i64: 1, 128>}, {transform_indices = @transform_3, window_bounds = array<i64: 64, 128>}]} {
    %c0 = arith.constant 0 : index
    %c0_0 = arith.constant 0 : index
    %0 = vector.load %arg1[%c0, %c0_0] : memref<64x64xbf16, #tpu.memory_space<vmem>>, vector<64x64xbf16>
    %c0_1 = arith.constant 0 : index
    %c0_2 = arith.constant 0 : index
    %1 = vector.load %arg2[%c0_1, %c0_2] : memref<64x128xbf16, #tpu.memory_space<vmem>>, vector<64x128xbf16>
    %cst = arith.constant dense<0.000000e+00> : vector<64x128xf32>
    %2 = tpu.matmul %0, %1, %cst {dimension_numbers = #tpu.dot_dimension_numbers<[1], [0], [0], [1], [0, 0, 1, 1], [], []>} : vector<64x64xbf16>, vector<64x128xbf16>, vector<64x128xf32> -> vector<64x128xf32>
    %c0_3 = arith.constant 0 : index
    %c0_4 = arith.constant 0 : index
    %3 = vector.load %arg3[%c0_3, %c0_4] : memref<1x128xf32, #tpu.memory_space<vmem>>, vector<1x128xf32>
    %4 = vector.broadcast %3 : vector<1x128xf32> to vector<64x128xf32>
    %5 = arith.addf %2, %4 : vector<64x128xf32>
    %c0_5 = arith.constant 0 : index
    %c0_6 = arith.constant 0 : index
    %6 = vector.load %arg4[%c0_5, %c0_6] : memref<64x128xf32, #tpu.memory_space<vmem>>, vector<64x128xf32>
    tpu.vector_store %arg4[%c0_5, %c0_6], %5 {strides = array<i32>} : memref<64x128xf32, #tpu.memory_space<vmem>>, vector<64x128xf32>,
    return
  }
  func.func @transform_0(%arg0: i32) -> (i32, i32) {
    %c0_i32 = arith.constant 0 : i32
    %c0_i32_0 = arith.constant 0 : i32
    return %arg0, %c0_i32 : i32, i32
  }
  func.func @transform_1(%arg0: i32) -> (i32, i32) {
    %c0_i32 = arith.constant 0 : i32
    %c0_i32_0 = arith.constant 0 : i32
    %c0_i32_1 = arith.constant 0 : i32
    return %c0_i32, %c0_i32_0 : i32, i32
  }
  func.func @transform_2(%arg0: i32) -> (i32, i32) {
    %c0_i32 = arith.constant 0 : i32
    %c0_i32_0 = arith.constant 0 : i32
    %c0_i32_1 = arith.constant 0 : i32
    return %c0_i32, %c0_i32_0 : i32, i32
  }
  func.func @transform_3(%arg0: i32) -> (i32, i32) {
    %c0_i32 = arith.constant 0 : i32
    %c0_i32_0 = arith.constant 0 : i32
    return %arg0, %c0_i32 : i32, i32
  }
}

</mosaic_0001>

<bundles_post_ra>
// kernel: period_forward.1
= control target key start
LH: loop header
LB: loop body
LE: loop exit
PB: predicated region body
PF: predicated region fallthrough
CT: control target
= control target key end

     0   :  { %vm83_vm0 = vcmask 523264   ;;  %s331_s0 = inlined_call_operand.vmem [shape: bf16[64,64], index: 0, kind: input, shape index: {}]   ;;  %s332_s1 = inlined_call_operand.vmem [shape: bf16[64,128], index: 1, kind: input, shape index: {}]   ;;  %s333_s2 = inlined_call_operand.vmem [shape: f32[1,128], index: 2, kind: input, shape index: {}]   ;;  %s334_s3 = inlined_call_operand.hbm [shape: f32[64,128], index: 3, kind: output, shape index: {}]  }
   0x1   :  { %v233_v0 = vld [vmem:[%s332_s1] sm:$0xff]   ;;  %v234_v1 = vld [vmem:[%s332_s1 + $0x8] sm:$0xff]   ;;  %v235_v2 = vld [vmem:[%s332_s1 + $0x10] sm:$0xff]  }
   0x2   :  { %206 = vmatprep.subr.bf16.mxu0 %v233_v0  ;;  %222 = vmatprep.subr.bf16.mxu1 %v233_v0  ;;  %v237_v3 = vld [vmem:[%s331_s0] sm:$0xff]   ;;  %v238_v4 = vld [vmem:[%s331_s0 + $0x10] sm:$0xff]   ;;  %v236_v5 = vld [vmem:[%s332_s1 + $0x18] sm:$0xff]  }
   0x3   :  { %207 = vmatpush3.bf16.msra.mxu0 %v233_v0  ;;  %226 = vmatpush3.bf16.msra.mxu1 %v233_v0 }
   0x4   :  { %208 = vmatprep.subr.bf16.mxu0 %v234_v1  ;;  %223 = vmatprep.subr.bf16.mxu1 %v234_v1 }
   0x5   :  { %214 = vmatprep.mubr.msk.bf16.mxu0 %vm83_vm0, %v237_v3 }
   0x7   :  { %209 = vmatpush3.bf16.msra.mxu0 %v234_v1  ;;  %227 = vmatpush3.bf16.msra.mxu1 %v234_v1 }
   0x8   :  { %210 = vmatprep.subr.bf16.mxu0 %v235_v2  ;;  %224 = vmatprep.subr.bf16.mxu1 %v235_v2 }
   0x9   :  { %8 = vsyncpa [#allocation3], 0  ;;  %218 = vmatprep.mubr.msk.bf16.mxu1 %vm83_vm0, %v238_v4  ;;  %v239_v6 = vld [vmem:[%s331_s0 + $0x8] sm:$0xff]   ;;  %v240_v7 = vld [vmem:[%s331_s0 + $0x18] sm:$0xff]   ;;  %s265_s29 = smov [#allocation2]  }
   0xa   :  { %v185_v8 = vld [vmem:[%s333_s2] ss:$0 sm:$0xff]  ;;  %s174_s30 = sshll.u32 %s265_s29, 4  ;;  %s175_s30 = int_to_ptr.vmem [resolvable:$true] %s174_s30 }
   0xb   :  { %211 = vmatpush3.bf16.msra.mxu0 %v235_v2  ;;  %228 = vmatpush3.bf16.msra.mxu1 %v235_v2  ;;  %s241_s0 = scalar_lea.vmem %s175_s30, 1024  ;;  %p246_p1 = scmp.lt.s32.totalorder %s175_s30, %s175_s30 }
   0xc   :  { %212 = vmatprep.subr.bf16.mxu0 %v236_v5  ;;  %225 = vmatprep.subr.bf16.mxu1 %v236_v5  ;;  %p242_p0 = scmp.ne.s32.totalorder %s175_s30, %s241_s0  ;;  %p247_p2 = scmp.lt.s32.totalorder %s241_s0, %s241_s0 }
   0xe   :  { %p248_p3 = por %p247_p2, %p246_p1 }
   0xf   :  { %213 = vmatpush3.bf16.msra.mxu0 %v236_v5  ;;  %229 = vmatpush3.bf16.msra.mxu1 %v236_v5 }
  0x10   :  { %p249_p4 = pnand %p248_p3, %p242_p0 }
  0x12   :  { %215 = vmatmul.mubr.msk.bf16.vlgmr.msra.gmra.mrb[0].mxu0 %vm83_vm0, %v239_v6  ;;  %219 = vmatmul.mubr.msk.bf16.vlgmr.msra.gmra.mrb[0].mxu1 %vm83_vm0, %v240_v7 }
  0xe5   :  { %v216_v9 = vpop.f32.mrb[0].mxu0  ;;  %v220_v10 = vpop.f32.mrb[0].mxu1 }
  0xe6   :  { %v139_v11 = vadd.f32 %v216_v9, %v185_v8  ;;  %v155_v12 = vadd.f32 %v220_v10, %v185_v8  ;;  %v130_v13 = vpop.f32.mrb[1].mxu0  ;;  %v146_v14 = vpop.f32.mrb[1].mxu1 }
  0xe7   :  { %v131_v15 = vadd.f32 %v185_v8, %v130_v13  ;;  %v147_v16 = vadd.f32 %v185_v8, %v146_v14  ;;  %v217_v17 = vpop.f32.mrb[2].mxu0  ;;  %v221_v18 = vpop.f32.mrb[2].mxu1 }
  0xe8   :  { %163 = vst [vmem:[#allocation2 + $0x10] sm:$0xff] %v139_v11  ;;  %167 = vst [vmem:[#allocation2 + $0x30] sm:$0xff] %v155_v12  ;;  %v142_v19 = vadd.f32 %v217_v17, %v185_v8  ;;  %v158_v20 = vadd.f32 %v221_v18, %v185_v8  ;;  %v133_v21 = vpop.f32.mrb[3].mxu0  ;;  %v149_v22 = vpop.f32.mrb[3].mxu1 }
  0xe9   :  { %161 = vst [vmem:[#allocation2] sm:$0xff] %v131_v15  ;;  %165 = vst [vmem:[#allocation2 + $0x20] sm:$0xff] %v147_v16  ;;  %v134_v23 = vadd.f32 %v185_v8, %v133_v21  ;;  %v150_v24 = vadd.f32 %v185_v8, %v149_v22 }
  0xea   :  { %164 = vst [vmem:[#allocation2 + $0x18] sm:$0xff] %v142_v19  ;;  %168 = vst [vmem:[#allocation2 + $0x38] sm:$0xff] %v158_v20 }
  0xeb   :  { %162 = vst [vmem:[#allocation2 + $0x8] sm:$0xff] %v134_v23  ;;  %166 = vst [vmem:[#allocation2 + $0x28] sm:$0xff] %v150_v24 }
  0xec   :  { %252 = shalt.err (!%p249_p4)
}
  0xed   :  { %s253_s5 = scalar_lea.hbm %s334_s3, 1024 }
  0xee   :  { %p254_p5 = scmp.ne.s32.totalorder %s334_s3, %s253_s5  ;;  %p257_p6 = scmp.lt.u32.totalorder %s253_s5, %s334_s3 }
  0xf0   :  { %p259_p7 = pnand %p257_p6, %p254_p5 }
  0xf2   :  { %262 = shalt.err (!%p259_p7)
}
  0xf3   :  { %s266_s10 = smov 128   ;;  %s267_s11 = smov 8  }
  0xf4   :  { %180 = dma.vmem_to_hbm [thread:$0]  %s175_s30, 1024, %s334_s3, [#allocation3], %s266_s10, %s266_s10, %s267_s11  }
  0xf5   :  { %263 = dma.done.wait [#allocation3], 1024  }
  0xf6   :  { %264 = vsyncadd [#allocation3], 4294966272 }
  0xf7   :  { %184 = vsyncpa [#allocation3], 1 }

</bundles_post_ra>
